<compile_context>
chip_gen: v7x
topology: tpu7x:2x2x1
jax: 0.10.0
libtpu: 0.0.40
codegen_flags: <defaults>
</compile_context>

<pallas_src>
import jax
import jax.numpy as jnp
from jax.experimental import pallas as pl
from jax.experimental.pallas import tpu as pltpu


def mlp_kernel(xT_ref, w1_ref, b1_ref, w2_ref, b2_ref, w3_ref, b3_ref, o_ref):
    # Layer 1: (64, D) @ (D, TM) + (64, 1)  -> ReLU
    h1 = jnp.dot(w1_ref[...], xT_ref[...], preferred_element_type=jnp.float32)
    h1 = jnp.maximum(h1 + b1_ref[...], 0.0)
    # Layer 2: (32, 64) @ (64, TM) + (32, 1) -> ReLU
    h2 = jnp.dot(w2_ref[...], h1, preferred_element_type=jnp.float32)
    h2 = jnp.maximum(h2 + b2_ref[...], 0.0)
    # Layer 3: (1, 32) @ (32, TM) + (1, 1)   -> Identity (lane-dense store)
    out = jnp.dot(w3_ref[...], h2, preferred_element_type=jnp.float32)
    o_ref[...] = (out + b3_ref[...]).astype(o_ref.dtype)


def simple_nn_forward(x, params, tm=2048):
    """x: (B, input_dim) f32.
    params: w{i}: (out_f, in_f)  (PyTorch layout), b{i}: (out_f, 1)."""
    B, D = x.shape
    out_dim = params["w3"].shape[0]

    # Batch tile: large (amortize per-step overhead), multiple of 128 (lane
    # width), clamped for small demo batches. Pad batch up to a multiple.
    TM = min(tm, max(128, ((B + 127) // 128) * 128))
    n_tiles = pl.cdiv(B, TM)
    Bp = n_tiles * TM

    # Wrapper-side layout plumbing: transpose + zero-pad batch once in HBM.
    xT = jnp.zeros((D, Bp), x.dtype).at[:, :B].set(x.T)

    def batch_block(shape):
        return pl.BlockSpec(shape, lambda i: (0, i))

    def resident(arr):
        # Constant index_map -> fetched once, stays resident across the grid.
        return pl.BlockSpec(arr.shape, lambda i: (0, 0))

    outT = pl.pallas_call(
        mlp_kernel,
        out_shape=jax.ShapeDtypeStruct((out_dim, Bp), jnp.float32),
        grid=(n_tiles,),
        in_specs=[
            batch_block((D, TM)),            # x^T, pipelined over batch tiles
            resident(params["w1"]), resident(params["b1"]),
            resident(params["w2"]), resident(params["b2"]),
            resident(params["w3"]), resident(params["b3"]),
        ],
        out_specs=batch_block((out_dim, TM)),
        compiler_params=pltpu.CompilerParams(
            dimension_semantics=("parallel",),      # 2 TCs on v7x
            vmem_limit_bytes=32 * 1024 * 1024,      # explicit, safe on v7x
        ),
    )(xT, params["w1"], params["b1"], params["w2"], params["b2"],
      params["w3"], params["b3"])

    return outT[:, :B].T  # back to (B, out_dim)


def init_params(key, input_dim, hidden_layers=(64, 32), output_dim=1):
    """Deterministic init mimicking PyTorch Linear default (uniform +/- 1/sqrt(fan_in)).
    Weights stored as (out_features, in_features); biases as (out_features, 1)."""
    dims = [input_dim] + list(hidden_layers) + [output_dim]
    params = {}
    for i in range(len(dims) - 1):
        fan_in, fan_out = dims[i], dims[i + 1]
        key, kw, kb = jax.random.split(key, 3)
        bound = 1.0 / (fan_in ** 0.5)
        params[f"w{i+1}"] = jax.random.uniform(
            kw, (fan_out, fan_in), jnp.float32, minval=-bound, maxval=bound)
        params[f"b{i+1}"] = jax.random.uniform(
            kb, (fan_out, 1), jnp.float32, minval=-bound, maxval=bound)
    return params


def reference_forward(x, params):
    h1 = jnp.maximum(x @ params["w1"].T + params["b1"].T, 0.0)
    h2 = jnp.maximum(h1 @ params["w2"].T + params["b2"].T, 0.0)
    return h2 @ params["w3"].T + params["b3"].T


if __name__ == "__main__":
    key = jax.random.PRNGKey(0)
    key, kx = jax.random.split(key)

    batch, input_dim = 8, 16
    x = jax.random.normal(kx, (batch, input_dim), jnp.float32)
    params = init_params(key, input_dim, hidden_layers=(64, 32), output_dim=1)

    out = simple_nn_forward(x, params)
    out = jax.block_until_ready(out)

    ref = reference_forward(x, params)
    assert out.shape == (batch, 1), out.shape
    assert jnp.allclose(out, ref, atol=1e-5, rtol=1e-5), "mismatch vs reference"

    print("KERNEL_OK")
</pallas_src>

<mosaic_0001>
module attributes {stable_mosaic.version = 11 : i64} {
  func.func @mlp_kernel(%arg0: i32, %arg1: memref<16x128xf32, #tpu.memory_space<vmem>>, %arg2: memref<64x16xf32, #tpu.memory_space<vmem>>, %arg3: memref<64x1xf32, #tpu.memory_space<vmem>>, %arg4: memref<32x64xf32, #tpu.memory_space<vmem>>, %arg5: memref<32x1xf32, #tpu.memory_space<vmem>>, %arg6: memref<1x32xf32, #tpu.memory_space<vmem>>, %arg7: memref<1x1xf32, #tpu.memory_space<vmem>>, %arg8: memref<1x128xf32, #tpu.memory_space<vmem>>) attributes {dimension_semantics = [#tpu.dimension_semantics<parallel>], iteration_bounds = array<i64: 1>, scalar_prefetch = 0 : i64, scratch_operands = 0 : i64, tpu.core_type = #tpu.core_type<tc>, window_params = [{transform_indices = @transform_0, window_bounds = array<i64: 16, 128>}, {pipeline_mode = #tpu.pipeline_mode<synchronous>, transform_indices = @transform_1, window_bounds = array<i64: 64, 16>}, {pipeline_mode = #tpu.pipeline_mode<synchronous>, transform_indices = @transform_2, window_bounds = array<i64: 64, 1>}, {pipeline_mode = #tpu.pipeline_mode<synchronous>, transform_indices = @transform_3, window_bounds = array<i64: 32, 64>}, {pipeline_mode = #tpu.pipeline_mode<synchronous>, transform_indices = @transform_4, window_bounds = array<i64: 32, 1>}, {pipeline_mode = #tpu.pipeline_mode<synchronous>, transform_indices = @transform_5, window_bounds = array<i64: 1, 32>}, {pipeline_mode = #tpu.pipeline_mode<synchronous>, transform_indices = @transform_6, window_bounds = array<i64: 1, 1>}, {transform_indices = @transform_7, window_bounds = array<i64: 1, 128>}]} {
    %c0 = arith.constant 0 : index
    %c0_0 = arith.constant 0 : index
    %0 = vector.load %arg2[%c0, %c0_0] : memref<64x16xf32, #tpu.memory_space<vmem>>, vector<64x16xf32>
    %c0_1 = arith.constant 0 : index
    %c0_2 = arith.constant 0 : index
    %1 = vector.load %arg1[%c0_1, %c0_2] : memref<16x128xf32, #tpu.memory_space<vmem>>, vector<16x128xf32>
    %cst = arith.constant dense<0.000000e+00> : vector<64x128xf32>
    %2 = tpu.matmul %0, %1, %cst {dimension_numbers = #tpu.dot_dimension_numbers<[1], [0], [0], [1], [0, 0, 1, 1], [], []>} : vector<64x16xf32>, vector<16x128xf32>, vector<64x128xf32> -> vector<64x128xf32>
    %c0_3 = arith.constant 0 : index
    %c0_4 = arith.constant 0 : index
    %3 = vector.load %arg3[%c0_3, %c0_4] : memref<64x1xf32, #tpu.memory_space<vmem>>, vector<64x1xf32>
    %4 = vector.broadcast %3 : vector<64x1xf32> to vector<64x128xf32>
    %5 = arith.addf %2, %4 : vector<64x128xf32>
    %cst_5 = arith.constant 0.000000e+00 : f32
    %6 = vector.broadcast %cst_5 : f32 to vector<64x128xf32>
    %7 = arith.maximumf %5, %6 : vector<64x128xf32>
    %c0_6 = arith.constant 0 : index
    %c0_7 = arith.constant 0 : index
    %8 = vector.load %arg4[%c0_6, %c0_7] : memref<32x64xf32, #tpu.memory_space<vmem>>, vector<32x64xf32>
    %cst_8 = arith.constant dense<0.000000e+00> : vector<32x128xf32>
    %9 = tpu.matmul %8, %7, %cst_8 {dimension_numbers = #tpu.dot_dimension_numbers<[1], [0], [0], [1], [0, 0, 1, 1], [], []>} : vector<32x64xf32>, vector<64x128xf32>, vector<32x128xf32> -> vector<32x128xf32>
    %c0_9 = arith.constant 0 : index
    %c0_10 = arith.constant 0 : index
    %10 = vector.load %arg5[%c0_9, %c0_10] : memref<32x1xf32, #tpu.memory_space<vmem>>, vector<32x1xf32>
    %11 = vector.broadcast %10 : vector<32x1xf32> to vector<32x128xf32>
    %12 = arith.addf %9, %11 : vector<32x128xf32>
    %cst_11 = arith.constant 0.000000e+00 : f32
    %13 = vector.broadcast %cst_11 : f32 to vector<32x128xf32>
    %14 = arith.maximumf %12, %13 : vector<32x128xf32>
    %c0_12 = arith.constant 0 : index
    %c0_13 = arith.constant 0 : index
    %15 = vector.load %arg6[%c0_12, %c0_13] : memref<1x32xf32, #tpu.memory_space<vmem>>, vector<1x32xf32>
    %cst_14 = arith.constant dense<0.000000e+00> : vector<1x128xf32>
    %16 = tpu.matmul %15, %14, %cst_14 {dimension_numbers = #tpu.dot_dimension_numbers<[1], [0], [0], [1], [0, 0, 1, 1], [], []>} : vector<1x32xf32>, vector<32x128xf32>, vector<1x128xf32> -> vector<1x128xf32>
    %c0_15 = arith.constant 0 : index
    %c0_16 = arith.constant 0 : index
    %17 = vector.load %arg7[%c0_15, %c0_16] : memref<1x1xf32, #tpu.memory_space<vmem>>, vector<1x1xf32>
    %18 = vector.broadcast %17 : vector<1x1xf32> to vector<1x128xf32>
    %19 = arith.addf %16, %18 : vector<1x128xf32>
    %c0_17 = arith.constant 0 : index
    %c0_18 = arith.constant 0 : index
    %20 = vector.load %arg8[%c0_17, %c0_18] : memref<1x128xf32, #tpu.memory_space<vmem>>, vector<1x128xf32>
    tpu.vector_store %arg8[%c0_17, %c0_18], %19 {strides = array<i32>} : memref<1x128xf32, #tpu.memory_space<vmem>>, vector<1x128xf32>,
    return
  }
  func.func @transform_0(%arg0: i32) -> (i32, i32) {
    %c0_i32 = arith.constant 0 : i32
    %c0_i32_0 = arith.constant 0 : i32
    return %c0_i32, %arg0 : i32, i32
  }
  func.func @transform_1(%arg0: i32) -> (i32, i32) {
    %c0_i32 = arith.constant 0 : i32
    %c0_i32_0 = arith.constant 0 : i32
    %c0_i32_1 = arith.constant 0 : i32
    return %c0_i32, %c0_i32_0 : i32, i32
  }
  func.func @transform_2(%arg0: i32) -> (i32, i32) {
    %c0_i32 = arith.constant 0 : i32
    %c0_i32_0 = arith.constant 0 : i32
    %c0_i32_1 = arith.constant 0 : i32
    return %c0_i32, %c0_i32_0 : i32, i32
  }
  func.func @transform_3(%arg0: i32) -> (i32, i32) {
    %c0_i32 = arith.constant 0 : i32
    %c0_i32_0 = arith.constant 0 : i32
    %c0_i32_1 = arith.constant 0 : i32
    return %c0_i32, %c0_i32_0 : i32, i32
  }
  func.func @transform_4(%arg0: i32) -> (i32, i32) {
    %c0_i32 = arith.constant 0 : i32
    %c0_i32_0 = arith.constant 0 : i32
    %c0_i32_1 = arith.constant 0 : i32
    return %c0_i32, %c0_i32_0 : i32, i32
  }
  func.func @transform_5(%arg0: i32) -> (i32, i32) {
    %c0_i32 = arith.constant 0 : i32
    %c0_i32_0 = arith.constant 0 : i32
    %c0_i32_1 = arith.constant 0 : i32
    return %c0_i32, %c0_i32_0 : i32, i32
  }
  func.func @transform_6(%arg0: i32) -> (i32, i32) {
    %c0_i32 = arith.constant 0 : i32
    %c0_i32_0 = arith.constant 0 : i32
    %c0_i32_1 = arith.constant 0 : i32
    return %c0_i32, %c0_i32_0 : i32, i32
  }
  func.func @transform_7(%arg0: i32) -> (i32, i32) {
    %c0_i32 = arith.constant 0 : i32
    %c0_i32_0 = arith.constant 0 : i32
    return %c0_i32, %arg0 : i32, i32
  }
}

</mosaic_0001>

<bundles_post_ra>
// kernel: tpu_custom_call.1
= control target key start
LH: loop header
LB: loop body
LE: loop exit
PB: predicated region body
PF: predicated region fallthrough
CT: control target
= control target key end

     0   :  { %s754_s0 = inlined_call_operand.vmem [shape: f32[16,128], index: 0, kind: input, shape index: {}]   ;;  %s755_s1 = inlined_call_operand.vmem [shape: f32[64,16], index: 1, kind: input, shape index: {}]   ;;  %s756_s2 = inlined_call_operand.vmem [shape: f32[64,1], index: 2, kind: input, shape index: {}]   ;;  %s757_s3 = inlined_call_operand.vmem [shape: f32[32,64], index: 3, kind: input, shape index: {}]   ;;  %s758_s4 = inlined_call_operand.vmem [shape: f32[32,1], index: 4, kind: input, shape index: {}]   ;;  %s759_s5 = inlined_call_operand.vmem [shape: f32[1,32], index: 5, kind: input, shape index: {}]   ;;  %s760_s6 = inlined_call_operand.<no memory space> [shape: f32[1,1], index: 6, kind: input, shape index: {}]   ;;  %s761_s7 = inlined_call_operand.hbm [shape: f32[1,128], index: 7, kind: output, shape index: {}]  }
   0x1   :  { %v12_v0 = vstv %s760_s6 }
   0x2   :  { %13 = vst [vmem:[#allocation2] sm:$0x1] %v12_v0 }
   0x3   :  { %v37_v1 = vld [vmem:[%s754_s0] sm:$0xff]  ;;  %v38_v2 = vld [vmem:[%s754_s0 + $0x8] sm:$0xff]  ;;  %vm87_vm0 = vcmask 130048   ;;  %v601_v5 = vmov 0   ;;  %v41_v8 = vld [vmem:[%s756_s2 + $0x10] sm:$0xff] }
   0x4   :  { %v29_v3 = vld [vmem:[%s755_s1] sm:$0xff]  ;;  %v544_v4 = vpack.c.bf16 %v38_v2, %v37_v1  ;;  %575 = vset.pattern.permute.xlu0 %v601_v5  ;;  %576 = vset.pattern.permute.xlu1 %v601_v5  ;;  %v30_v7 = vld [vmem:[%s755_s1 + $0x8] sm:$0xff]  ;;  %v31_v9 = vld [vmem:[%s755_s1 + $0x10] sm:$0xff] }
   0x5   :  { %499 = vmatprep.mubr.msk.f32.mxu0 %vm87_vm0, %v29_v3  ;;  %v39_v6 = vld [vmem:[%s756_s2] sm:$0xff]  ;;  %v40_v10 = vld [vmem:[%s756_s2 + $0x8] sm:$0xff]  ;;  %59 = vperm.xlu1 %576, %v41_v8   ;;  %v42_v11 = vld [vmem:[%s756_s2 + $0x18] sm:$0xff] }
   0x6   :  { %545 = vmatprep.subr.bf16.mxu0 %v544_v4  ;;  %49 = vperm.xlu0 %575, %v39_v6  }
   0x7   :  { %547 = vmatpush3.bf16.msra.mxu0 %v544_v4 }
   0xa   :  { %500 = vmatmul.mubr.msk.f32.vlgmr.msra.gmra.mrb[0].mxu0 %vm87_vm0, %v30_v7 }
   0xb   :  { %14 = vsyncpa [#allocation4], 0  ;;  %502 = vmatprep.mubr.msk.f32.mxu0 %vm87_vm0, %v31_v9  ;;  %v32_v12 = vld [vmem:[%s755_s1 + $0x18] sm:$0xff]  ;;  %54 = vperm.xlu0 %575, %v40_v10   ;;  %v33_v13 = vld [vmem:[%s755_s1 + $0x20] sm:$0xff]  ;;  %vm253_vm1 = vcmask 523264   ;;  %v602_v2 = vmov 0.0|0.0  }
   0xc   :  { %v43_v14 = vld [vmem:[%s756_s2 + $0x20] sm:$0xff]  ;;  %64 = vperm.xlu1 %576, %v42_v11   ;;  %v44_v15 = vld [vmem:[%s756_s2 + $0x28] sm:$0xff]  ;;  %v35_v17 = vld [vmem:[%s755_s1 + $0x30] sm:$0xff]  ;;  %564 = vmatprep.subr.bf16.mxu0 %v602_v2  ;;  %vm603_vm2 = vmmov 0   ;;  %v604_v3 = vmov 0.0   ;;  %vm366_vm3 = vcmask 261120  }
   0xd   :  { %v34_v16 = vld [vmem:[%s755_s1 + $0x28] sm:$0xff]  ;;  %v45_v18 = vld [vmem:[%s756_s2 + $0x30] sm:$0xff]  ;;  %v46_v19 = vld [vmem:[%s756_s2 + $0x38] sm:$0xff]  ;;  %s605_s26 = smov [#allocation3]  }
   0xe   :  { %503 = vmatmul.mubr.msk.f32.gmra.mrb[2].mxu0 %vm87_vm0, %v32_v12  ;;  %v36_v20 = vld [vmem:[%s755_s1 + $0x38] sm:$0xff]  ;;  %v229_v21 = vld [vmem:[%s758_s4] sm:$0xff]  ;;  %v230_v22 = vld [vmem:[%s758_s4 + $0x8] sm:$0xff]  ;;  %s447_s27 = sshll.u32 %s605_s26, 4  ;;  %s448_s27 = int_to_ptr.vmem [resolvable:$true] %s447_s27 }
   0xf   :  { %505 = vmatprep.mubr.msk.f32.mxu0 %vm87_vm0, %v33_v13  ;;  %69 = vperm.xlu0 %575, %v43_v14   ;;  %v231_v23 = vld [vmem:[%s758_s4 + $0x10] sm:$0xff]  ;;  %v232_v24 = vld [vmem:[%s758_s4 + $0x18] sm:$0xff]  ;;  %v356_v25 = vld [vmem:[#allocation2] sm:$0x1]  ;;  %s577_s28 = scalar_lea.vmem %s448_s27, 16  ;;  %s581_s29 = scalar_lea.vmem %s448_s27, 32 }
  0x10   :  { %74 = vperm.xlu1 %576, %v44_v15   ;;  %v225_v26 = vld [vmem:[%s757_s3] sm:$0xff]  ;;  %v226_v63 = vld [vmem:[%s757_s3 + $0x8] sm:$0xff]  ;;  %v227_v0 = vld [vmem:[%s757_s3 + $0x10] sm:$0xff]  ;;  %p578_p0 = scmp.ne.s32.totalorder %s448_s27, %s577_s28  ;;  %p582_p1 = scmp.lt.s32.totalorder %s448_s27, %s448_s27 }
  0x11   :  { %527 = vmatprep.mubr.msk.f32.mxu1 %vm253_vm1, %v225_v26  ;;  %v228_v1 = vld [vmem:[%s757_s3 + $0x18] sm:$0xff]  ;;  %p583_p2 = scmp.lt.s32.totalorder %s581_s29, %s577_s28 }
  0x12   :  { %506 = vmatmul.mubr.msk.f32.gmra.mrb[4].mxu0 %vm87_vm0, %v34_v16 }
  0x13   :  { %508 = vmatprep.mubr.msk.f32.mxu0 %vm87_vm0, %v35_v17  ;;  %79 = vperm.xlu0 %575, %v45_v18   ;;  %p584_p3 = por %p583_p2, %p582_p1 }
  0x14   :  { %84 = vperm.xlu1 %576, %v46_v19  }
  0x15   :  { %p585_p4 = pnand %p584_p3, %p578_p0 }
  0x16   :  { %509 = vmatmul.mubr.msk.f32.gmra.mrb[6].mxu0 %vm87_vm0, %v36_v20 }
  0x17   :  { %235 = vperm.xlu0 %575, %v229_v21   ;;  %541 = vmatprep.mubr.msk.f32.mxu0 %vm603_vm2, %v604_v3 }
  0x18   :  { %240 = vperm.xlu1 %576, %v230_v22   ;;  %v355_v22 = vld [vmem:[%s759_s5] sm:$0x1] }
  0x1b   :  { %245 = vperm.xlu0 %575, %v231_v23   ;;  %v362_v23 = vlaneseq }
  0x1c   :  { %250 = vperm.xlu1 %576, %v232_v24  }
  0x1d   :  { %v363_v24 = vshrl.u32 %v362_v23, 7 }
  0x1f   :  { %359 = vperm.xlu0 %575, %v356_v25   ;;  %v364_v25 = vsub.s32 0, %v363_v24 }
  0x84   :  { %v60_v28 = vpop.permute.xlu1 %59 }
  0x85   :  { %v50_v27 = vpop.permute.xlu0 %49 }
  0x8a   :  { %v55_v29 = vpop.permute.xlu0 %54 }
  0x8b   :  { %v65_v30 = vpop.permute.xlu1 %64 }
  0x8e   :  { %v70_v43 = vpop.permute.xlu0 %69 }
  0x8f   :  { %v75_v40 = vpop.permute.xlu1 %74 }
  0x92   :  { %v80_v55 = vpop.permute.xlu0 %79 }
  0x93   :  { %v85_v52 = vpop.permute.xlu1 %84 }
  0x96   :  { %v236_v5 = vpop.permute.xlu0 %235 }
  0x97   :  { %v241_v4 = vpop.permute.xlu1 %240 }
  0x9a   :  { %v246_v14 = vpop.permute.xlu0 %245 }
  0x9b   :  { %v251_v11 = vpop.permute.xlu1 %250 }
  0x9e   :  { %v360_v26 = vpop.permute.xlu0 %359 }
  0xdd   :  { %v501_v31 = vpop.f32.mrb[0].mxu0 }
  0xde   :  { %v184_v32 = vadd.f32 %v501_v31, %v55_v29  ;;  %v178_v33 = vpop.f32.mrb[1].mxu0 }
  0xdf   :  { %v179_v34 = vadd.f32 %v178_v33, %v50_v27  ;;  %v365_v27 = vrot.slane %v360_v26, %v364_v25 }
  0xe0   :  { %v218_v35 = vmax.f32 %v184_v32, 0.0 }
  0xe1   :  { %v217_v36 = vmax.f32 %v179_v34, 0.0  ;;  %v504_v37 = vpop.f32.mrb[2].mxu0 }
  0xe2   :  { %v194_v38 = vadd.f32 %v504_v37, %v65_v30  ;;  %v188_v39 = vpop.f32.mrb[3].mxu0 }
  0xe3   :  { %v189_v41 = vadd.f32 %v188_v39, %v60_v28  ;;  %v548_v42 = vpack.c.bf16 %v218_v35, %v217_v36 }
  0xe4   :  { %v220_v44 = vmax.f32 %v194_v38, 0.0 }
  0xe5   :  { %v219_v45 = vmax.f32 %v189_v41, 0.0  ;;  %v507_v46 = vpop.f32.mrb[4].mxu0  ;;  %549 = vmatprep.subr.bf16.mxu1 %v548_v42 }
  0xe6   :  { %v204_v47 = vadd.f32 %v507_v46, %v75_v40  ;;  %v198_v48 = vpop.f32.mrb[5].mxu0  ;;  %551 = vmatpush3.bf16.msra.mxu1 %v548_v42 }
  0xe7   :  { %v552_v49 = vpack.c.bf16 %v220_v44, %v219_v45  ;;  %v199_v50 = vadd.f32 %v198_v48, %v70_v43 }
  0xe8   :  { %v222_v51 = vmax.f32 %v204_v47, 0.0 }
  0xe9   :  { %v221_v53 = vmax.f32 %v199_v50, 0.0  ;;  %v510_v54 = vpop.f32.mrb[6].mxu0  ;;  %553 = vmatprep.subr.bf16.mxu1 %v552_v49 }
  0xea   :  { %v214_v56 = vadd.f32 %v510_v54, %v85_v52  ;;  %v208_v57 = vpop.f32.mrb[7].mxu0  ;;  %555 = vmatpush3.bf16.msra.mxu1 %v552_v49 }
  0xeb   :  { %v556_v58 = vpack.c.bf16 %v222_v51, %v221_v53  ;;  %v209_v59 = vadd.f32 %v208_v57, %v80_v55 }
  0xec   :  { %v224_v60 = vmax.f32 %v214_v56, 0.0 }
  0xed   :  { %v223_v61 = vmax.f32 %v209_v59, 0.0  ;;  %557 = vmatprep.subr.bf16.mxu1 %v556_v58 }
  0xee   :  { %559 = vmatpush3.bf16.msra.mxu1 %v556_v58 }
  0xef   :  { %v560_v62 = vpack.c.bf16 %v224_v60, %v223_v61 }
  0xf1   :  { %561 = vmatprep.subr.bf16.mxu1 %v560_v62 }
  0xf2   :  { %563 = vmatpush3.bf16.msra.mxu1 %v560_v62 }
  0xf5   :  { %528 = vmatmul.mubr.msk.f32.vlgmr.msra.gmra.mrb[0].mxu1 %vm253_vm1, %v226_v63 }
  0xf6   :  { %530 = vmatprep.mubr.msk.f32.mxu1 %vm253_vm1, %v227_v0 }
  0xf9   :  { %531 = vmatmul.mubr.msk.f32.gmra.mrb[2].mxu1 %vm253_vm1, %v228_v1 }
 0x1c8   :  { %v529_v6 = vpop.f32.mrb[0].mxu1 }
 0x1c9   :  { %v338_v7 = vadd.f32 %v529_v6, %v241_v4  ;;  %v332_v8 = vpop.f32.mrb[1].mxu1 }
 0x1ca   :  { %v333_v9 = vadd.f32 %v332_v8, %v236_v5 }
 0x1cb   :  { %v352_v10 = vmax.f32 %v338_v7, 0.0 }
 0x1cc   :  { %v351_v12 = vmax.f32 %v333_v9, 0.0  ;;  %v532_v13 = vpop.f32.mrb[2].mxu1 }
 0x1cd   :  { %v348_v15 = vadd.f32 %v532_v13, %v251_v11  ;;  %v342_v16 = vpop.f32.mrb[3].mxu1 }
 0x1ce   :  { %v565_v17 = vpack.c.bf16 %v352_v10, %v351_v12  ;;  %v343_v18 = vadd.f32 %v342_v16, %v246_v14 }
 0x1cf   :  { %v354_v19 = vmax.f32 %v348_v15, 0.0 }
 0x1d0   :  { %v353_v20 = vmax.f32 %v343_v18, 0.0  ;;  %566 = vmatpush3.bf16.msra.mxu0 %v565_v17 }
 0x1d1   :  { %567 = vmatprep.subr.bf16.mxu0 %v602_v2 }
 0x1d2   :  { %v568_v21 = vpack.c.bf16 %v354_v19, %v353_v20 }
 0x1d4   :  { %569 = vmatpush3.bf16.msra.mxu0 %v568_v21 }
 0x1d7   :  { %542 = vmatmul.mubr.msk.f32.vlgmr.msra.gmra.mrb[8].mxu0 %vm366_vm3, %v355_v22 }
 0x2aa   :  { %v436_v28 = vpop.f32.mrb[8].mxu0 }
 0x2ab   :  { %v437_v29 = vadd.f32 %v436_v28, %v365_v27  ;;  %v543_v30 = vpop.f32.mrb[9].mxu0 }
 0x2ad   :  { %440 = vst [vmem:[#allocation3] sm:$0x1] %v437_v29 }
 0x2ae   :  { %588 = shalt.err (!%p585_p4)
}
 0x2af   :  { %s589_s8 = scalar_lea.hbm %s761_s7, 16 }
 0x2b0   :  { %p590_p5 = scmp.ne.s32.totalorder %s761_s7, %s589_s8  ;;  %p593_p6 = scmp.lt.u32.totalorder %s589_s8, %s761_s7 }
 0x2b2   :  { %p595_p7 = pnand %p593_p6, %p590_p5 }
 0x2b4   :  { %598 = shalt.err (!%p595_p7)
}
 0x2b5   :  { %450 = dma.vmem_to_hbm [thread:$0]  %s448_s27, 16, %s761_s7, [#allocation4]  }
 0x2b6   :  { %599 = dma.done.wait [#allocation4], 16  }
 0x2b7   :  { %600 = vsyncadd [#allocation4], 4294967280 }
 0x2b8   :  { %454 = vsyncpa [#allocation4], 1 }

</bundles_post_ra>
